<compile_context>
chip_gen: v7x
topology: tpu7x:2x2x1
jax: 0.10.0
libtpu: 0.0.40
codegen_flags: <defaults>
</compile_context>

<pallas_src>
import math
import numpy as np
import jax
import jax.numpy as jnp
from jax import lax
from jax.experimental import pallas as pl
from jax.experimental.pallas import tpu as pltpu

# ----------------------------- configuration --------------------------------
B, S = 2, 8            # batch, sequence length
H = 32                 # hidden size
NH = 4                 # number of attention heads
HD = H // NH           # head size
FF = 128               # intermediate (feed-forward) size
EPS = 1e-12            # LayerNorm eps
INIT_RANGE = 0.02      # initializer stddev (init_linear)


# ------------------------------ Pallas kernel --------------------------------
def _layer_norm(x, gamma, beta):
    mean = jnp.mean(x, axis=-1, keepdims=True)
    xc = x - mean
    var = jnp.mean(xc * xc, axis=-1, keepdims=True)
    return xc * lax.rsqrt(var + EPS) * gamma + beta


def _encoder_kernel(inp_ref, mask_ref,
                    wqkv_ref, bqkv_ref,
                    wd_ref, bd_ref, g1_ref, b1_ref,
                    wi_ref, bi_ref, wo_ref, bo_ref, g2_ref, b2_ref,
                    out_ref, ctx_ref):
    """Full encoder layer over the whole (B*S, H) slab in one invocation."""
    x = inp_ref[...]                                              # (B*S, H)

    # fused QKV projection: one MXU pass producing 3H output lanes
    qkv = jnp.dot(x, wqkv_ref[...],
                  preferred_element_type=jnp.float32) + bqkv_ref[...]

    scale = 1.0 / math.sqrt(HD)

    # masked per-(batch, head) attention, statically unrolled (B*NH = 8)
    for b in range(B):
        rows = slice(b * S, (b + 1) * S)
        # additive mask bias computed on the VPU (no host-side HBM bias array)
        bias = (1.0 - mask_ref[b]) * -10000.0                     # (S, S)
        for h in range(NH):
            q_h = qkv[rows, h * HD:(h + 1) * HD]                  # (S, HD)
            k_h = qkv[rows, H + h * HD:H + (h + 1) * HD]          # (S, HD)
            v_h = qkv[rows, 2 * H + h * HD:2 * H + (h + 1) * HD]  # (S, HD)

            # q . k^T via transposed-operand contraction (no XLU transpose)
            s = lax.dot_general(q_h, k_h, (((1,), (1,)), ((), ())),
                                preferred_element_type=jnp.float32)
            s = s * scale + bias
            s = s - jnp.max(s, axis=-1, keepdims=True)            # stable softmax
            p = jnp.exp(s)
            p = p * pl.reciprocal(jnp.sum(p, axis=-1, keepdims=True),
                                  approx=True)

            # write this head's context straight into the VMEM staging slab
            ctx_ref[rows, h * HD:(h + 1) * HD] = jnp.dot(
                p, v_h, preferred_element_type=jnp.float32)

    ctx = ctx_ref[...]                                            # (B*S, H)

    # dense -> residual add & LayerNorm
    xd = jnp.dot(ctx, wd_ref[...],
                 preferred_element_type=jnp.float32) + bd_ref[...]
    x1 = _layer_norm(x + xd, g1_ref[...], b1_ref[...])

    # intermediate -> exact gelu (erf) -> output -> residual add & LayerNorm
    hf = jnp.dot(x1, wi_ref[...],
                 preferred_element_type=jnp.float32) + bi_ref[...]
    hf = 0.5 * hf * (1.0 + lax.erf(hf * (1.0 / math.sqrt(2.0))))
    x2 = jnp.dot(hf, wo_ref[...],
                 preferred_element_type=jnp.float32) + bo_ref[...]
    out_ref[...] = _layer_norm(x1 + x2, g2_ref[...], b2_ref[...])


# ------------------------------ Python wrapper -------------------------------
def pack_params(p):
    """One-time repack into kernel layout: (in,out) weights, fused QKV, 2-D biases.

    Done once at parameter-build time so the per-call wrapper does no weight
    transposes / reshapes.
    """
    return dict(
        wqkv=jnp.concatenate([p["Wq"].T, p["Wk"].T, p["Wv"].T], axis=1),  # (H, 3H)
        bqkv=jnp.concatenate([p["bq"], p["bk"], p["bv"]]).reshape(1, 3 * H),
        wd=p["Wd"].T, bd=p["bd"].reshape(1, H),
        g1=p["g1"].reshape(1, H), b1=p["b1"].reshape(1, H),
        wi=p["Wi"].T, bi=p["bi"].reshape(1, FF),
        wo=p["Wo"].T, bo=p["bo"].reshape(1, H),
        g2=p["g2"].reshape(1, H), b2=p["b2"].reshape(1, H),
    )


def transformer_encoder(inp, att_mask, kp):
    """inp: (B*S, H) f32;  att_mask: (B, 1, S, S) f32 (1 = attend, 0 = masked)."""
    mask = att_mask.reshape(B, S, S)   # metadata-only squeeze of the head dim
    return pl.pallas_call(
        _encoder_kernel,
        out_shape=jax.ShapeDtypeStruct((B * S, H), jnp.float32),
        scratch_shapes=[pltpu.VMEM((B * S, H), jnp.float32)],     # ctx staging slab
    )(inp, mask,
      kp["wqkv"], kp["bqkv"],
      kp["wd"], kp["bd"], kp["g1"], kp["b1"],
      kp["wi"], kp["bi"], kp["wo"], kp["bo"], kp["g2"], kp["b2"])


# --------------------------- pure-JAX reference ------------------------------
def reference(inp, att_mask, p):
    def lin(x, w, b):              # torch Linear: y = x @ W.T + b, W is (out, in)
        return x @ w.T + b

    def ln(x, g, b):
        m = x.mean(-1, keepdims=True)
        v = ((x - m) ** 2).mean(-1, keepdims=True)
        return (x - m) / jnp.sqrt(v + EPS) * g + b

    def split_heads(x):            # (B*S, H) -> (B, NH, S, HD)
        return x.reshape(B, S, NH, HD).transpose(0, 2, 1, 3)

    q = split_heads(lin(inp, p["Wq"], p["bq"]))
    k = split_heads(lin(inp, p["Wk"], p["bk"]))
    v = split_heads(lin(inp, p["Wv"], p["bv"]))
    scores = jnp.einsum("bhqd,bhkd->bhqk", q, k) / math.sqrt(HD)
    scores = scores + (1.0 - att_mask) * -10000.0
    probs = jax.nn.softmax(scores, axis=-1)
    ctx = jnp.einsum("bhqk,bhkd->bhqd", probs, v)
    ctx = ctx.transpose(0, 2, 1, 3).reshape(B * S, H)

    x = lin(ctx, p["Wd"], p["bd"])
    x = ln(inp + x, p["g1"], p["b1"])
    h = lin(x, p["Wi"], p["bi"])
    h = 0.5 * h * (1.0 + jax.scipy.special.erf(h / math.sqrt(2.0)))
    x2 = lin(h, p["Wo"], p["bo"])
    return ln(x + x2, p["g2"], p["b2"])


# ----------------------------------- main ------------------------------------
def make_params(key):
    names = ["Wq", "Wk", "Wv", "Wd", "Wi", "Wo"]
    shapes = {"Wq": (H, H), "Wk": (H, H), "Wv": (H, H),
              "Wd": (H, H), "Wi": (FF, H), "Wo": (H, FF)}
    keys = jax.random.split(key, len(names))
    p = {n: INIT_RANGE * jax.random.normal(k, shapes[n], jnp.float32)
         for n, k in zip(names, keys)}
    p.update(bq=jnp.zeros((H,), jnp.float32), bk=jnp.zeros((H,), jnp.float32),
             bv=jnp.zeros((H,), jnp.float32), bd=jnp.zeros((H,), jnp.float32),
             bi=jnp.zeros((FF,), jnp.float32), bo=jnp.zeros((H,), jnp.float32),
             g1=jnp.ones((H,), jnp.float32), b1=jnp.zeros((H,), jnp.float32),
             g2=jnp.ones((H,), jnp.float32), b2=jnp.zeros((H,), jnp.float32))
    return p


if __name__ == "__main__":
    root = jax.random.PRNGKey(0)
    k_inp, k_par = jax.random.split(root)

    inp = jax.random.normal(k_inp, (B * S, H), jnp.float32)

    # attention mask [B, 1, S, S]: batch 0 attends everywhere, batch 1 masks
    # out the last two key positions.
    mask = np.ones((B, 1, S, S), np.float32)
    mask[1, :, :, S - 2:] = 0.0
    att_mask = jnp.asarray(mask)

    params = make_params(k_par)
    kparams = pack_params(params)          # one-time kernel-layout repack

    out = transformer_encoder(inp, att_mask, kparams)
    out = jax.block_until_ready(out)

    ref = reference(inp, att_mask, params)
    max_diff = float(jnp.max(jnp.abs(out - ref)))
    assert out.shape == (B * S, H)
    assert max_diff < 1e-3, f"mismatch vs reference: {max_diff}"

    print("KERNEL_OK")
</pallas_src>

<mosaic_0001>
module attributes {stable_mosaic.version = 11 : i64} {
  func.func @_encoder_kernel(%arg0: memref<16x32xf32, #tpu.memory_space<vmem>>, %arg1: memref<2x8x8xf32, #tpu.memory_space<vmem>>, %arg2: memref<32x96xf32, #tpu.memory_space<vmem>>, %arg3: memref<1x96xf32, #tpu.memory_space<vmem>>, %arg4: memref<32x32xf32, #tpu.memory_space<vmem>>, %arg5: memref<1x32xf32, #tpu.memory_space<vmem>>, %arg6: memref<1x32xf32, #tpu.memory_space<vmem>>, %arg7: memref<1x32xf32, #tpu.memory_space<vmem>>, %arg8: memref<32x128xf32, #tpu.memory_space<vmem>>, %arg9: memref<1x128xf32, #tpu.memory_space<vmem>>, %arg10: memref<128x32xf32, #tpu.memory_space<vmem>>, %arg11: memref<1x32xf32, #tpu.memory_space<vmem>>, %arg12: memref<1x32xf32, #tpu.memory_space<vmem>>, %arg13: memref<1x32xf32, #tpu.memory_space<vmem>>, %arg14: memref<16x32xf32, #tpu.memory_space<vmem>>, %arg15: memref<16x32xf32, #tpu.memory_space<vmem>>) attributes {dimension_semantics = [], scalar_prefetch = 0 : i64, scratch_operands = 1 : i64, tpu.core_type = #tpu.core_type<tc>} {
    %c0 = arith.constant 0 : index
    %c0_0 = arith.constant 0 : index
    %0 = vector.load %arg0[%c0, %c0_0] : memref<16x32xf32, #tpu.memory_space<vmem>>, vector<16x32xf32>
    %c0_1 = arith.constant 0 : index
    %c0_2 = arith.constant 0 : index
    %1 = vector.load %arg2[%c0_1, %c0_2] : memref<32x96xf32, #tpu.memory_space<vmem>>, vector<32x96xf32>
    %cst = arith.constant dense<0.000000e+00> : vector<16x96xf32>
    %2 = tpu.matmul %0, %1, %cst {dimension_numbers = #tpu.dot_dimension_numbers<[1], [0], [0], [1], [0, 0, 1, 1], [], []>} : vector<16x32xf32>, vector<32x96xf32>, vector<16x96xf32> -> vector<16x96xf32>
    %c0_3 = arith.constant 0 : index
    %c0_4 = arith.constant 0 : index
    %3 = vector.load %arg3[%c0_3, %c0_4] : memref<1x96xf32, #tpu.memory_space<vmem>>, vector<1x96xf32>
    %4 = vector.broadcast %3 : vector<1x96xf32> to vector<16x96xf32>
    %5 = arith.addf %2, %4 : vector<16x96xf32>
    %c0_5 = arith.constant 0 : index
    %c0_6 = arith.constant 0 : index
    %c0_7 = arith.constant 0 : index
    %6 = vector.load %arg1[%c0_5, %c0_6, %c0_7] : memref<2x8x8xf32, #tpu.memory_space<vmem>>, vector<1x8x8xf32>
    %7 = vector.shape_cast %6 : vector<1x8x8xf32> to vector<8x8xf32>
    %cst_8 = arith.constant 1.000000e+00 : f32
    %8 = vector.broadcast %cst_8 : f32 to vector<8x8xf32>
    %9 = arith.subf %8, %7 : vector<8x8xf32>
    %cst_9 = arith.constant -1.000000e+04 : f32
    %10 = vector.broadcast %cst_9 : f32 to vector<8x8xf32>
    %11 = arith.mulf %9, %10 : vector<8x8xf32>
    %12 = vector.extract_strided_slice %5 {offsets = [0, 0], sizes = [8, 8], strides = [1, 1]} : vector<16x96xf32> to vector<8x8xf32>
    %13 = vector.extract_strided_slice %5 {offsets = [0, 32], sizes = [8, 8], strides = [1, 1]} : vector<16x96xf32> to vector<8x8xf32>
    %14 = vector.extract_strided_slice %5 {offsets = [0, 64], sizes = [8, 8], strides = [1, 1]} : vector<16x96xf32> to vector<8x8xf32>
    %cst_10 = arith.constant dense<0.000000e+00> : vector<8x8xf32>
    %15 = tpu.matmul %12, %13, %cst_10 {dimension_numbers = #tpu.dot_dimension_numbers<[1], [1], [0], [0], [0, 0, 1, 0], [], []>} : vector<8x8xf32>, vector<8x8xf32>, vector<8x8xf32> -> vector<8x8xf32>
    %cst_11 = arith.constant 0.353553385 : f32
    %16 = vector.broadcast %cst_11 : f32 to vector<8x8xf32>
    %17 = arith.mulf %15, %16 : vector<8x8xf32>
    %18 = arith.addf %17, %11 : vector<8x8xf32>
    %cst_12 = arith.constant dense<0xFF800000> : vector<8xf32>
    %19 = vector.multi_reduction <maximumf>, %18, %cst_12 [1] : vector<8x8xf32> to vector<8xf32>
    %20 = vector.shape_cast %19 : vector<8xf32> to vector<8x1xf32>
    %21 = vector.broadcast %20 : vector<8x1xf32> to vector<8x8xf32>
    %22 = arith.subf %18, %21 : vector<8x8xf32>
    %23 = math.exp %22 : vector<8x8xf32>
    %cst_13 = arith.constant dense<0.000000e+00> : vector<8xf32>
    %24 = vector.multi_reduction <add>, %23, %cst_13 [1] : vector<8x8xf32> to vector<8xf32>
    %25 = vector.shape_cast %24 : vector<8xf32> to vector<8x1xf32>
    %26 = tpu.reciprocal %25 {approx = true} : vector<8x1xf32> -> vector<8x1xf32>
    %27 = vector.broadcast %26 : vector<8x1xf32> to vector<8x8xf32>
    %28 = arith.mulf %23, %27 : vector<8x8xf32>
    %cst_14 = arith.constant dense<0.000000e+00> : vector<8x8xf32>
    %29 = tpu.matmul %28, %14, %cst_14 {dimension_numbers = #tpu.dot_dimension_numbers<[1], [0], [0], [1], [0, 0, 1, 1], [], []>} : vector<8x8xf32>, vector<8x8xf32>, vector<8x8xf32> -> vector<8x8xf32>
    %c0_15 = arith.constant 0 : index
    %c0_16 = arith.constant 0 : index
    %30 = vector.load %arg15[%c0_15, %c0_16] : memref<16x32xf32, #tpu.memory_space<vmem>>, vector<8x8xf32>
    tpu.vector_store %arg15[%c0_15, %c0_16], %29 {strides = array<i32>} : memref<16x32xf32, #tpu.memory_space<vmem>>, vector<8x8xf32>,
    %31 = vector.extract_strided_slice %5 {offsets = [0, 8], sizes = [8, 8], strides = [1, 1]} : vector<16x96xf32> to vector<8x8xf32>
    %32 = vector.extract_strided_slice %5 {offsets = [0, 40], sizes = [8, 8], strides = [1, 1]} : vector<16x96xf32> to vector<8x8xf32>
    %33 = vector.extract_strided_slice %5 {offsets = [0, 72], sizes = [8, 8], strides = [1, 1]} : vector<16x96xf32> to vector<8x8xf32>
    %cst_17 = arith.constant dense<0.000000e+00> : vector<8x8xf32>
    %34 = tpu.matmul %31, %32, %cst_17 {dimension_numbers = #tpu.dot_dimension_numbers<[1], [1], [0], [0], [0, 0, 1, 0], [], []>} : vector<8x8xf32>, vector<8x8xf32>, vector<8x8xf32> -> vector<8x8xf32>
    %cst_18 = arith.constant 0.353553385 : f32
    %35 = vector.broadcast %cst_18 : f32 to vector<8x8xf32>
    %36 = arith.mulf %34, %35 : vector<8x8xf32>
    %37 = arith.addf %36, %11 : vector<8x8xf32>
    %cst_19 = arith.constant dense<0xFF800000> : vector<8xf32>
    %38 = vector.multi_reduction <maximumf>, %37, %cst_19 [1] : vector<8x8xf32> to vector<8xf32>
    %39 = vector.shape_cast %38 : vector<8xf32> to vector<8x1xf32>
    %40 = vector.broadcast %39 : vector<8x1xf32> to vector<8x8xf32>
    %41 = arith.subf %37, %40 : vector<8x8xf32>
    %42 = math.exp %41 : vector<8x8xf32>
    %cst_20 = arith.constant dense<0.000000e+00> : vector<8xf32>
    %43 = vector.multi_reduction <add>, %42, %cst_20 [1] : vector<8x8xf32> to vector<8xf32>
    %44 = vector.shape_cast %43 : vector<8xf32> to vector<8x1xf32>
    %45 = tpu.reciprocal %44 {approx = true} : vector<8x1xf32> -> vector<8x1xf32>
    %46 = vector.broadcast %45 : vector<8x1xf32> to vector<8x8xf32>
    %47 = arith.mulf %42, %46 : vector<8x8xf32>
    %cst_21 = arith.constant dense<0.000000e+00> : vector<8x8xf32>
    %48 = tpu.matmul %47, %33, %cst_21 {dimension_numbers = #tpu.dot_dimension_numbers<[1], [0], [0], [1], [0, 0, 1, 1], [], []>} : vector<8x8xf32>, vector<8x8xf32>, vector<8x8xf32> -> vector<8x8xf32>
    %c0_22 = arith.constant 0 : index
    %c8 = arith.constant 8 : index
    %49 = vector.load %arg15[%c0_22, %c8] : memref<16x32xf32, #tpu.memory_space<vmem>>, vector<8x8xf32>
    tpu.vector_store %arg15[%c0_22, %c8], %48 {strides = array<i32>} : memref<16x32xf32, #tpu.memory_space<vmem>>, vector<8x8xf32>,
    %50 = vector.extract_strided_slice %5 {offsets = [0, 16], sizes = [8, 8], strides = [1, 1]} : vector<16x96xf32> to vector<8x8xf32>
    %51 = vector.extract_strided_slice %5 {offsets = [0, 48], sizes = [8, 8], strides = [1, 1]} : vector<16x96xf32> to vector<8x8xf32>
    %52 = vector.extract_strided_slice %5 {offsets = [0, 80], sizes = [8, 8], strides = [1, 1]} : vector<16x96xf32> to vector<8x8xf32>
    %cst_23 = arith.constant dense<0.000000e+00> : vector<8x8xf32>
    %53 = tpu.matmul %50, %51, %cst_23 {dimension_numbers = #tpu.dot_dimension_numbers<[1], [1], [0], [0], [0, 0, 1, 0], [], []>} : vector<8x8xf32>, vector<8x8xf32>, vector<8x8xf32> -> vector<8x8xf32>
    %cst_24 = arith.constant 0.353553385 : f32
    %54 = vector.broadcast %cst_24 : f32 to vector<8x8xf32>
    %55 = arith.mulf %53, %54 : vector<8x8xf32>
    %56 = arith.addf %55, %11 : vector<8x8xf32>
    %cst_25 = arith.constant dense<0xFF800000> : vector<8xf32>
    %57 = vector.multi_reduction <maximumf>, %56, %cst_25 [1] : vector<8x8xf32> to vector<8xf32>
    %58 = vector.shape_cast %57 : vector<8xf32> to vector<8x1xf32>
    %59 = vector.broadcast %58 : vector<8x1xf32> to vector<8x8xf32>
    %60 = arith.subf %56, %59 : vector<8x8xf32>
    %61 = math.exp %60 : vector<8x8xf32>
    %cst_26 = arith.constant dense<0.000000e+00> : vector<8xf32>
    %62 = vector.multi_reduction <add>, %61, %cst_26 [1] : vector<8x8xf32> to vector<8xf32>
    %63 = vector.shape_cast %62 : vector<8xf32> to vector<8x1xf32>
    %64 = tpu.reciprocal %63 {approx = true} : vector<8x1xf32> -> vector<8x1xf32>
    %65 = vector.broadcast %64 : vector<8x1xf32> to vector<8x8xf32>
    %66 = arith.mulf %61, %65 : vector<8x8xf32>
    %cst_27 = arith.constant dense<0.000000e+00> : vector<8x8xf32>
    %67 = tpu.matmul %66, %52, %cst_27 {dimension_numbers = #tpu.dot_dimension_numbers<[1], [0], [0], [1], [0, 0, 1, 1], [], []>} : vector<8x8xf32>, vector<8x8xf32>, vector<8x8xf32> -> vector<8x8xf32>
    %c0_28 = arith.constant 0 : index
    %c16 = arith.constant 16 : index
    %68 = vector.load %arg15[%c0_28, %c16] : memref<16x32xf32, #tpu.memory_space<vmem>>, vector<8x8xf32>
    tpu.vector_store %arg15[%c0_28, %c16], %67 {strides = array<i32>} : memref<16x32xf32, #tpu.memory_space<vmem>>, vector<8x8xf32>,
    %69 = vector.extract_strided_slice %5 {offsets = [0, 24], sizes = [8, 8], strides = [1, 1]} : vector<16x96xf32> to vector<8x8xf32>
    %70 = vector.extract_strided_slice %5 {offsets = [0, 56], sizes = [8, 8], strides = [1, 1]} : vector<16x96xf32> to vector<8x8xf32>
    %71 = vector.extract_strided_slice %5 {offsets = [0, 88], sizes = [8, 8], strides = [1, 1]} : vector<16x96xf32> to vector<8x8xf32>
    %cst_29 = arith.constant dense<0.000000e+00> : vector<8x8xf32>
    %72 = tpu.matmul %69, %70, %cst_29 {dimension_numbers = #tpu.dot_dimension_numbers<[1], [1], [0], [0], [0, 0, 1, 0], [], []>} : vector<8x8xf32>, vector<8x8xf32>, vector<8x8xf32> -> vector<8x8xf32>
    %cst_30 = arith.constant 0.353553385 : f32
    %73 = vector.broadcast %cst_30 : f32 to vector<8x8xf32>
    %74 = arith.mulf %72, %73 : vector<8x8xf32>
    %75 = arith.addf %74, %11 : vector<8x8xf32>
    %cst_31 = arith.constant dense<0xFF800000> : vector<8xf32>
    %76 = vector.multi_reduction <maximumf>, %75, %cst_31 [1] : vector<8x8xf32> to vector<8xf32>
    %77 = vector.shape_cast %76 : vector<8xf32> to vector<8x1xf32>
    %78 = vector.broadcast %77 : vector<8x1xf32> to vector<8x8xf32>
    %79 = arith.subf %75, %78 : vector<8x8xf32>
    %80 = math.exp %79 : vector<8x8xf32>
    %cst_32 = arith.constant dense<0.000000e+00> : vector<8xf32>
    %81 = vector.multi_reduction <add>, %80, %cst_32 [1] : vector<8x8xf32> to vector<8xf32>
    %82 = vector.shape_cast %81 : vector<8xf32> to vector<8x1xf32>
    %83 = tpu.reciprocal %82 {approx = true} : vector<8x1xf32> -> vector<8x1xf32>
    %84 = vector.broadcast %83 : vector<8x1xf32> to vector<8x8xf32>
    %85 = arith.mulf %80, %84 : vector<8x8xf32>
    %cst_33 = arith.constant dense<0.000000e+00> : vector<8x8xf32>
    %86 = tpu.matmul %85, %71, %cst_33 {dimension_numbers = #tpu.dot_dimension_numbers<[1], [0], [0], [1], [0, 0, 1, 1], [], []>} : vector<8x8xf32>, vector<8x8xf32>, vector<8x8xf32> -> vector<8x8xf32>
    %c0_34 = arith.constant 0 : index
    %c24 = arith.constant 24 : index
    %87 = vector.load %arg15[%c0_34, %c24] : memref<16x32xf32, #tpu.memory_space<vmem>>, vector<8x8xf32>
    tpu.vector_store %arg15[%c0_34, %c24], %86 {strides = array<i32>} : memref<16x32xf32, #tpu.memory_space<vmem>>, vector<8x8xf32>,
    %c1 = arith.constant 1 : index
    %c0_35 = arith.constant 0 : index
    %c0_36 = arith.constant 0 : index
    %88 = vector.load %arg1[%c1, %c0_35, %c0_36] : memref<2x8x8xf32, #tpu.memory_space<vmem>>, vector<1x8x8xf32>
    %89 = vector.shape_cast %88 : vector<1x8x8xf32> to vector<8x8xf32>
    %cst_37 = arith.constant 1.000000e+00 : f32
    %90 = vector.broadcast %cst_37 : f32 to vector<8x8xf32>
    %91 = arith.subf %90, %89 : vector<8x8xf32>
    %cst_38 = arith.constant -1.000000e+04 : f32
    %92 = vector.broadcast %cst_38 : f32 to vector<8x8xf32>
    %93 = arith.mulf %91, %92 : vector<8x8xf32>
    %94 = vector.extract_strided_slice %5 {offsets = [8, 0], sizes = [8, 8], strides = [1, 1]} : vector<16x96xf32> to vector<8x8xf32>
    %95 = vector.extract_strided_slice %5 {offsets = [8, 32], sizes = [8, 8], strides = [1, 1]} : vector<16x96xf32> to vector<8x8xf32>
    %96 = vector.extract_strided_slice %5 {offsets = [8, 64], sizes = [8, 8], strides = [1, 1]} : vector<16x96xf32> to vector<8x8xf32>
    %cst_39 = arith.constant dense<0.000000e+00> : vector<8x8xf32>
    %97 = tpu.matmul %94, %95, %cst_39 {dimension_numbers = #tpu.dot_dimension_numbers<[1], [1], [0], [0], [0, 0, 1, 0], [], []>} : vector<8x8xf32>, vector<8x8xf32>, vector<8x8xf32> -> vector<8x8xf32>
    %cst_40 = arith.constant 0.353553385 : f32
    %98 = vector.broadcast %cst_40 : f32 to vector<8x8xf32>
    %99 = arith.mulf %97, %98 : vector<8x8xf32>
    %100 = arith.addf %99, %93 : vector<8x8xf32>
    %cst_41 = arith.constant dense<0xFF800000> : vector<8xf32>
    %101 = vector.multi_reduction <maximumf>, %100, %cst_41 [1] : vector<8x8xf32> to vector<8xf32>
    %102 = vector.shape_cast %101 : vector<8xf32> to vector<8x1xf32>
    %103 = vector.broadcast %102 : vector<8x1xf32> to vector<8x8xf32>
    %104 = arith.subf %100, %103 : vector<8x8xf32>
    %105 = math.exp %104 : vector<8x8xf32>
    %cst_42 = arith.constant dense<0.000000e+00> : vector<8xf32>
    %106 = vector.multi_reduction <add>, %105, %cst_42 [1] : vector<8x8xf32> to vector<8xf32>
    %107 = vector.shape_cast %106 : vector<8xf32> to vector<8x1xf32>
    %108 = tpu.reciprocal %107 {approx = true} : vector<8x1xf32> -> vector<8x1xf32>
    %109 = vector.broadcast %108 : vector<8x1xf32> to vector<8x8xf32>
    %110 = arith.mulf %105, %109 : vector<8x8xf32>
    %cst_43 = arith.constant dense<0.000000e+00> : vector<8x8xf32>
    %111 = tpu.matmul %110, %96, %cst_43 {dimension_numbers = #tpu.dot_dimension_numbers<[1], [0], [0], [1], [0, 0, 1, 1], [], []>} : vector<8x8xf32>, vector<8x8xf32>, vector<8x8xf32> -> vector<8x8xf32>
    %c8_44 = arith.constant 8 : index
    %c0_45 = arith.constant 0 : index
    %112 = vector.load %arg15[%c8_44, %c0_45] : memref<16x32xf32, #tpu.memory_space<vmem>>, vector<8x8xf32>
    tpu.vector_store %arg15[%c8_44, %c0_45], %111 {strides = array<i32>} : memref<16x32xf32, #tpu.memory_space<vmem>>, vector<8x8xf32>,
    %113 = vector.extract_strided_slice %5 {offsets = [8, 8], sizes = [8, 8], strides = [1, 1]} : vector<16x96xf32> to vector<8x8xf32>
    %114 = vector.extract_strided_slice %5 {offsets = [8, 40], sizes = [8, 8], strides = [1, 1]} : vector<16x96xf32> to vector<8x8xf32>
    %115 = vector.extract_strided_slice %5 {offsets = [8, 72], sizes = [8, 8], strides = [1, 1]} : vector<16x96xf32> to vector<8x8xf32>
    %cst_46 = arith.constant dense<0.000000e+00> : vector<8x8xf32>
    %116 = tpu.matmul %113, %114, %cst_46 {dimension_numbers = #tpu.dot_dimension_numbers<[1], [1], [0], [0], [0, 0, 1, 0], [], []>} : vector<8x8xf32>, vector<8x8xf32>, vector<8x8xf32> -> vector<8x8xf32>
    %cst_47 = arith.constant 0.353553385 : f32
    %117 = vector.broadcast %cst_47 : f32 to vector<8x8xf32>
    %118 = arith.mulf %116, %117 : vector<8x8xf32>
    %119 = arith.addf %118, %93 : vector<8x8xf32>
    %cst_48 = arith.constant dense<0xFF800000> : vector<8xf32>
    %120 = vector.multi_reduction <maximumf>, %119, %cst_48 [1] : vector<8x8xf32> to vector<8xf32>
    %121 = vector.shape_cast %120 : vector<8xf32> to vector<8x1xf32>
    %122 = vector.broadcast %121 : vector<8x1xf32> to vector<8x8xf32>
    %123 = arith.subf %119, %122 : vector<8x8xf32>
    %124 = math.exp %123 : vector<8x8xf32>
    %cst_49 = arith.constant dense<0.000000e+00> : vector<8xf32>
    %125 = vector.multi_reduction <add>, %124, %cst_49 [1] : vector<8x8xf32> to vector<8xf32>
    %126 = vector.shape_cast %125 : vector<8xf32> to vector<8x1xf32>
    %127 = tpu.reciprocal %126 {approx = true} : vector<8x1xf32> -> vector<8x1xf32>
    %128 = vector.broadcast %127 : vector<8x1xf32> to vector<8x8xf32>
    %129 = arith.mulf %124, %128 : vector<8x8xf32>
    %cst_50 = arith.constant dense<0.000000e+00> : vector<8x8xf32>
    %130 = tpu.matmul %129, %115, %cst_50 {dimension_numbers = #tpu.dot_dimension_numbers<[1], [0], [0], [1], [0, 0, 1, 1], [], []>} : vector<8x8xf32>, vector<8x8xf32>, vector<8x8xf32> -> vector<8x8xf32>
    %c8_51 = arith.constant 8 : index
    %c8_52 = arith.constant 8 : index
    %131 = vector.load %arg15[%c8_51, %c8_52] : memref<16x32xf32, #tpu.memory_space<vmem>>, vector<8x8xf32>
    tpu.vector_store %arg15[%c8_51, %c8_52], %130 {strides = array<i32>} : memref<16x32xf32, #tpu.memory_space<vmem>>, vector<8x8xf32>,
    %132 = vector.extract_strided_slice %5 {offsets = [8, 16], sizes = [8, 8], strides = [1, 1]} : vector<16x96xf32> to vector<8x8xf32>
    %133 = vector.extract_strided_slice %5 {offsets = [8, 48], sizes = [8, 8], strides = [1, 1]} : vector<16x96xf32> to vector<8x8xf32>
    %134 = vector.extract_strided_slice %5 {offsets = [8, 80], sizes = [8, 8], strides = [1, 1]} : vector<16x96xf32> to vector<8x8xf32>
    %cst_53 = arith.constant dense<0.000000e+00> : vector<8x8xf32>
    %135 = tpu.matmul %132, %133, %cst_53 {dimension_numbers = #tpu.dot_dimension_numbers<[1], [1], [0], [0], [0, 0, 1, 0], [], []>} : vector<8x8xf32>, vector<8x8xf32>, vector<8x8xf32> -> vector<8x8xf32>
    %cst_54 = arith.constant 0.353553385 : f32
    %136 = vector.broadcast %cst_54 : f32 to vector<8x8xf32>
    %137 = arith.mulf %135, %136 : vector<8x8xf32>
    %138 = arith.addf %137, %93 : vector<8x8xf32>
    %cst_55 = arith.constant dense<0xFF800000> : vector<8xf32>
    %139 = vector.multi_reduction <maximumf>, %138, %cst_55 [1] : vector<8x8xf32> to vector<8xf32>
    %140 = vector.shape_cast %139 : vector<8xf32> to vector<8x1xf32>
    %141 = vector.broadcast %140 : vector<8x1xf32> to vector<8x8xf32>
    %142 = arith.subf %138, %141 : vector<8x8xf32>
    %143 = math.exp %142 : vector<8x8xf32>
    %cst_56 = arith.constant dense<0.000000e+00> : vector<8xf32>
    %144 = vector.multi_reduction <add>, %143, %cst_56 [1] : vector<8x8xf32> to vector<8xf32>
    %145 = vector.shape_cast %144 : vector<8xf32> to vector<8x1xf32>
    %146 = tpu.reciprocal %145 {approx = true} : vector<8x1xf32> -> vector<8x1xf32>
    %147 = vector.broadcast %146 : vector<8x1xf32> to vector<8x8xf32>
    %148 = arith.mulf %143, %147 : vector<8x8xf32>
    %cst_57 = arith.constant dense<0.000000e+00> : vector<8x8xf32>
    %149 = tpu.matmul %148, %134, %cst_57 {dimension_numbers = #tpu.dot_dimension_numbers<[1], [0], [0], [1], [0, 0, 1, 1], [], []>} : vector<8x8xf32>, vector<8x8xf32>, vector<8x8xf32> -> vector<8x8xf32>
    %c8_58 = arith.constant 8 : index
    %c16_59 = arith.constant 16 : index
    %150 = vector.load %arg15[%c8_58, %c16_59] : memref<16x32xf32, #tpu.memory_space<vmem>>, vector<8x8xf32>
    tpu.vector_store %arg15[%c8_58, %c16_59], %149 {strides = array<i32>} : memref<16x32xf32, #tpu.memory_space<vmem>>, vector<8x8xf32>,
    %151 = vector.extract_strided_slice %5 {offsets = [8, 24], sizes = [8, 8], strides = [1, 1]} : vector<16x96xf32> to vector<8x8xf32>
    %152 = vector.extract_strided_slice %5 {offsets = [8, 56], sizes = [8, 8], strides = [1, 1]} : vector<16x96xf32> to vector<8x8xf32>
    %153 = vector.extract_strided_slice %5 {offsets = [8, 88], sizes = [8, 8], strides = [1, 1]} : vector<16x96xf32> to vector<8x8xf32>
    %cst_60 = arith.constant dense<0.000000e+00> : vector<8x8xf32>
    %154 = tpu.matmul %151, %152, %cst_60 {dimension_numbers = #tpu.dot_dimension_numbers<[1], [1], [0], [0], [0, 0, 1, 0], [], []>} : vector<8x8xf32>, vector<8x8xf32>, vector<8x8xf32> -> vector<8x8xf32>
    %cst_61 = arith.constant 0.353553385 : f32
    %155 = vector.broadcast %cst_61 : f32 to vector<8x8xf32>
    %156 = arith.mulf %154, %155 : vector<8x8xf32>
    %157 = arith.addf %156, %93 : vector<8x8xf32>
    %cst_62 = arith.constant dense<0xFF800000> : vector<8xf32>
    %158 = vector.multi_reduction <maximumf>, %157, %cst_62 [1] : vector<8x8xf32> to vector<8xf32>
    %159 = vector.shape_cast %158 : vector<8xf32> to vector<8x1xf32>
    %160 = vector.broadcast %159 : vector<8x1xf32> to vector<8x8xf32>
    %161 = arith.subf %157, %160 : vector<8x8xf32>
    %162 = math.exp %161 : vector<8x8xf32>
    %cst_63 = arith.constant dense<0.000000e+00> : vector<8xf32>
    %163 = vector.multi_reduction <add>, %162, %cst_63 [1] : vector<8x8xf32> to vector<8xf32>
    %164 = vector.shape_cast %163 : vector<8xf32> to vector<8x1xf32>
    %165 = tpu.reciprocal %164 {approx = true} : vector<8x1xf32> -> vector<8x1xf32>
    %166 = vector.broadcast %165 : vector<8x1xf32> to vector<8x8xf32>
    %167 = arith.mulf %162, %166 : vector<8x8xf32>
    %cst_64 = arith.constant dense<0.000000e+00> : vector<8x8xf32>
    %168 = tpu.matmul %167, %153, %cst_64 {dimension_numbers = #tpu.dot_dimension_numbers<[1], [0], [0], [1], [0, 0, 1, 1], [], []>} : vector<8x8xf32>, vector<8x8xf32>, vector<8x8xf32> -> vector<8x8xf32>
    %c8_65 = arith.constant 8 : index
    %c24_66 = arith.constant 24 : index
    %169 = vector.load %arg15[%c8_65, %c24_66] : memref<16x32xf32, #tpu.memory_space<vmem>>, vector<8x8xf32>
    tpu.vector_store %arg15[%c8_65, %c24_66], %168 {strides = array<i32>} : memref<16x32xf32, #tpu.memory_space<vmem>>, vector<8x8xf32>,
    %c0_67 = arith.constant 0 : index
    %c0_68 = arith.constant 0 : index
    %170 = vector.load %arg15[%c0_67, %c0_68] : memref<16x32xf32, #tpu.memory_space<vmem>>, vector<16x32xf32>
    %c0_69 = arith.constant 0 : index
    %c0_70 = arith.constant 0 : index
    %171 = vector.load %arg4[%c0_69, %c0_70] : memref<32x32xf32, #tpu.memory_space<vmem>>, vector<32x32xf32>
    %cst_71 = arith.constant dense<0.000000e+00> : vector<16x32xf32>
    %172 = tpu.matmul %170, %171, %cst_71 {dimension_numbers = #tpu.dot_dimension_numbers<[1], [0], [0], [1], [0, 0, 1, 1], [], []>} : vector<16x32xf32>, vector<32x32xf32>, vector<16x32xf32> -> vector<16x32xf32>
    %c0_72 = arith.constant 0 : index
    %c0_73 = arith.constant 0 : index
    %173 = vector.load %arg5[%c0_72, %c0_73] : memref<1x32xf32, #tpu.memory_space<vmem>>, vector<1x32xf32>
    %174 = vector.broadcast %173 : vector<1x32xf32> to vector<16x32xf32>
    %175 = arith.addf %172, %174 : vector<16x32xf32>
    %176 = arith.addf %0, %175 : vector<16x32xf32>
    %c0_74 = arith.constant 0 : index
    %c0_75 = arith.constant 0 : index
    %177 = vector.load %arg6[%c0_74, %c0_75] : memref<1x32xf32, #tpu.memory_space<vmem>>, vector<1x32xf32>
    %c0_76 = arith.constant 0 : index
    %c0_77 = arith.constant 0 : index
    %178 = vector.load %arg7[%c0_76, %c0_77] : memref<1x32xf32, #tpu.memory_space<vmem>>, vector<1x32xf32>
    %cst_78 = arith.constant dense<0.000000e+00> : vector<16xf32>
    %179 = vector.multi_reduction <add>, %176, %cst_78 [1] : vector<16x32xf32> to vector<16xf32>
    %180 = vector.shape_cast %179 : vector<16xf32> to vector<16x1xf32>
    %cst_79 = arith.constant 3.200000e+01 : f32
    %181 = vector.broadcast %cst_79 : f32 to vector<16x1xf32>
    %182 = arith.divf %180, %181 : vector<16x1xf32>
    %183 = vector.broadcast %182 : vector<16x1xf32> to vector<16x32xf32>
    %184 = arith.subf %176, %183 : vector<16x32xf32>
    %185 = arith.mulf %184, %184 : vector<16x32xf32>
    %cst_80 = arith.constant dense<0.000000e+00> : vector<16xf32>
    %186 = vector.multi_reduction <add>, %185, %cst_80 [1] : vector<16x32xf32> to vector<16xf32>
    %187 = vector.shape_cast %186 : vector<16xf32> to vector<16x1xf32>
    %cst_81 = arith.constant 3.200000e+01 : f32
    %188 = vector.broadcast %cst_81 : f32 to vector<16x1xf32>
    %189 = arith.divf %187, %188 : vector<16x1xf32>
    %cst_82 = arith.constant 9.99999996E-13 : f32
    %190 = vector.broadcast %cst_82 : f32 to vector<16x1xf32>
    %191 = arith.addf %189, %190 : vector<16x1xf32>
    %192 = math.rsqrt %191 : vector<16x1xf32>
    %193 = vector.broadcast %192 : vector<16x1xf32> to vector<16x32xf32>
    %194 = arith.mulf %184, %193 : vector<16x32xf32>
    %195 = vector.broadcast %177 : vector<1x32xf32> to vector<16x32xf32>
    %196 = arith.mulf %194, %195 : vector<16x32xf32>
    %197 = vector.broadcast %178 : vector<1x32xf32> to vector<16x32xf32>
    %198 = arith.addf %196, %197 : vector<16x32xf32>
    %c0_83 = arith.constant 0 : index
    %c0_84 = arith.constant 0 : index
    %199 = vector.load %arg8[%c0_83, %c0_84] : memref<32x128xf32, #tpu.memory_space<vmem>>, vector<32x128xf32>
    %cst_85 = arith.constant dense<0.000000e+00> : vector<16x128xf32>
    %200 = tpu.matmul %198, %199, %cst_85 {dimension_numbers = #tpu.dot_dimension_numbers<[1], [0], [0], [1], [0, 0, 1, 1], [], []>} : vector<16x32xf32>, vector<32x128xf32>, vector<16x128xf32> -> vector<16x128xf32>
    %c0_86 = arith.constant 0 : index
    %c0_87 = arith.constant 0 : index
    %201 = vector.load %arg9[%c0_86, %c0_87] : memref<1x128xf32, #tpu.memory_space<vmem>>, vector<1x128xf32>
    %202 = vector.broadcast %201 : vector<1x128xf32> to vector<16x128xf32>
    %203 = arith.addf %200, %202 : vector<16x128xf32>
    %cst_88 = arith.constant 5.000000e-01 : f32
    %204 = vector.broadcast %cst_88 : f32 to vector<16x128xf32>
    %205 = arith.mulf %204, %203 : vector<16x128xf32>
    %cst_89 = arith.constant 0.707106769 : f32
    %206 = vector.broadcast %cst_89 : f32 to vector<16x128xf32>
    %207 = arith.mulf %203, %206 : vector<16x128xf32>
    %208 = math.erf %207 : vector<16x128xf32>
    %cst_90 = arith.constant 1.000000e+00 : f32
    %209 = vector.broadcast %cst_90 : f32 to vector<16x128xf32>
    %210 = arith.addf %209, %208 : vector<16x128xf32>
    %211 = arith.mulf %205, %210 : vector<16x128xf32>
    %c0_91 = arith.constant 0 : index
    %c0_92 = arith.constant 0 : index
    %212 = vector.load %arg10[%c0_91, %c0_92] : memref<128x32xf32, #tpu.memory_space<vmem>>, vector<128x32xf32>
    %cst_93 = arith.constant dense<0.000000e+00> : vector<16x32xf32>
    %213 = tpu.matmul %211, %212, %cst_93 {dimension_numbers = #tpu.dot_dimension_numbers<[1], [0], [0], [1], [0, 0, 1, 1], [], []>} : vector<16x128xf32>, vector<128x32xf32>, vector<16x32xf32> -> vector<16x32xf32>
    %c0_94 = arith.constant 0 : index
    %c0_95 = arith.constant 0 : index
    %214 = vector.load %arg11[%c0_94, %c0_95] : memref<1x32xf32, #tpu.memory_space<vmem>>, vector<1x32xf32>
    %215 = vector.broadcast %214 : vector<1x32xf32> to vector<16x32xf32>
    %216 = arith.addf %213, %215 : vector<16x32xf32>
    %217 = arith.addf %198, %216 : vector<16x32xf32>
    %c0_96 = arith.constant 0 : index
    %c0_97 = arith.constant 0 : index
    %218 = vector.load %arg12[%c0_96, %c0_97] : memref<1x32xf32, #tpu.memory_space<vmem>>, vector<1x32xf32>
    %c0_98 = arith.constant 0 : index
    %c0_99 = arith.constant 0 : index
    %219 = vector.load %arg13[%c0_98, %c0_99] : memref<1x32xf32, #tpu.memory_space<vmem>>, vector<1x32xf32>
    %cst_100 = arith.constant dense<0.000000e+00> : vector<16xf32>
    %220 = vector.multi_reduction <add>, %217, %cst_100 [1] : vector<16x32xf32> to vector<16xf32>
    %221 = vector.shape_cast %220 : vector<16xf32> to vector<16x1xf32>
    %cst_101 = arith.constant 3.200000e+01 : f32
    %222 = vector.broadcast %cst_101 : f32 to vector<16x1xf32>
    %223 = arith.divf %221, %222 : vector<16x1xf32>
    %224 = vector.broadcast %223 : vector<16x1xf32> to vector<16x32xf32>
    %225 = arith.subf %217, %224 : vector<16x32xf32>
    %226 = arith.mulf %225, %225 : vector<16x32xf32>
    %cst_102 = arith.constant dense<0.000000e+00> : vector<16xf32>
    %227 = vector.multi_reduction <add>, %226, %cst_102 [1] : vector<16x32xf32> to vector<16xf32>
    %228 = vector.shape_cast %227 : vector<16xf32> to vector<16x1xf32>
    %cst_103 = arith.constant 3.200000e+01 : f32
    %229 = vector.broadcast %cst_103 : f32 to vector<16x1xf32>
    %230 = arith.divf %228, %229 : vector<16x1xf32>
    %cst_104 = arith.constant 9.99999996E-13 : f32
    %231 = vector.broadcast %cst_104 : f32 to vector<16x1xf32>
    %232 = arith.addf %230, %231 : vector<16x1xf32>
    %233 = math.rsqrt %232 : vector<16x1xf32>
    %234 = vector.broadcast %233 : vector<16x1xf32> to vector<16x32xf32>
    %235 = arith.mulf %225, %234 : vector<16x32xf32>
    %236 = vector.broadcast %218 : vector<1x32xf32> to vector<16x32xf32>
    %237 = arith.mulf %235, %236 : vector<16x32xf32>
    %238 = vector.broadcast %219 : vector<1x32xf32> to vector<16x32xf32>
    %239 = arith.addf %237, %238 : vector<16x32xf32>
    %c0_105 = arith.constant 0 : index
    %c0_106 = arith.constant 0 : index
    %240 = vector.load %arg14[%c0_105, %c0_106] : memref<16x32xf32, #tpu.memory_space<vmem>>, vector<16x32xf32>
    tpu.vector_store %arg14[%c0_105, %c0_106], %239 {strides = array<i32>} : memref<16x32xf32, #tpu.memory_space<vmem>>, vector<16x32xf32>,
    return
  }
}

</mosaic_0001>

<bundles_post_ra>
// kernel: tpu_custom_call.1
= control target key start
LH: loop header
LB: loop body
LE: loop exit
PB: predicated region body
PF: predicated region fallthrough
CT: control target
= control target key end

     0   :  { %vm61_vm0 = vcmask 261120   ;;  %s2719_s0 = inlined_call_operand.vmem [shape: f32[16,32], index: 0, kind: input, shape index: {}]   ;;  %s2720_s1 = inlined_call_operand.vmem [shape: f32[2,8,8], index: 1, kind: input, shape index: {}]   ;;  %s2721_s2 = inlined_call_operand.vmem [shape: f32[32,96], index: 2, kind: input, shape index: {}]   ;;  %s2722_s3 = inlined_call_operand.vmem [shape: f32[1,96], index: 3, kind: input, shape index: {}]   ;;  %s2723_s4 = inlined_call_operand.vmem [shape: f32[32,32], index: 4, kind: input, shape index: {}]   ;;  %s2724_s5 = inlined_call_operand.vmem [shape: f32[1,32], index: 5, kind: input, shape index: {}]   ;;  %s2725_s6 = inlined_call_operand.vmem [shape: f32[1,32], index: 6, kind: input, shape index: {}]   ;;  %s2726_s7 = inlined_call_operand.vmem [shape: f32[1,32], index: 7, kind: input, shape index: {}]   ;;  %s2727_s8 = inlined_call_operand.vmem [shape: f32[32,128], index: 8, kind: input, shape index: {}]   ;;  %s2728_s9 = inlined_call_operand.vmem [shape: f32[1,128], index: 9, kind: input, shape index: {}]   ;;  %s2729_s10 = inlined_call_operand.vmem [shape: f32[128,32], index: 10, kind: input, shape index: {}]   ;;  %s2730_s11 = inlined_call_operand.vmem [shape: f32[1,32], index: 11, kind: input, shape index: {}]   ;;  %s2731_s12 = inlined_call_operand.vmem [shape: f32[1,32], index: 12, kind: input, shape index: {}]   ;;  %s2732_s13 = inlined_call_operand.vmem [shape: f32[1,32], index: 13, kind: input, shape index: {}]   ;;  %s2733_s14 = inlined_call_operand.hbm [shape: f32[16,32], index: 14, kind: output, shape index: {}]  }
   0x1   :  { %v50_v0 = vld [vmem:[%s2721_s2] sm:$0xff]  ;;  %v51_v1 = vld [vmem:[%s2721_s2 + $0x8] sm:$0xff]  ;;  %v52_v2 = vld [vmem:[%s2721_s2 + $0x10] sm:$0xff] }
   0x2   :  { %v2180_v3 = vpack.c.bf16 %v51_v1, %v50_v0  ;;  %v53_v4 = vld [vmem:[%s2721_s2 + $0x18] sm:$0xff]  ;;  %v2430_v5 = vld [vmem:[%s2719_s0] sm:$0xff] }
   0x3   :  { %v2184_v6 = vpack.c.bf16 %v53_v4, %v52_v2  ;;  %2040 = vmatprep.mubr.msk.f32.mxu1 %vm61_vm0, %v2430_v5 }
   0x4   :  { %19 = vsyncpa [#allocation4], 0  ;;  %2181 = vmatprep.subr.bf16.mxu1 %v2180_v3  ;;  %v2437_v7 = vld [vmem:[%s2719_s0 + $0x8] sm:$0xff]  ;;  %v2322_v8 = vmov 0.0   ;;  %vm2323_vm1 = vmmov 0   ;;  %s2324_s0 = smov 120  }
   0x5   :  { %2183 = vmatpush3.bf16.msra.mxu1 %v2180_v3  ;;  %2053 = vmatprep.subr.mxu0 %v2322_v8  ;;  %v1925_v9 = vld [vmem:[%s2722_s3] ss:$0 sm:$0xff]  ;;  %s2325_s26 = smov 96   ;;  %s2326_s27 = smov 80   ;;  %vm149_vm2 = vcmask 64512   ;;  %v1940_v42 = vld [vmem:[%s2720_s1 + $0x8] sm:$0xff] }
   0x6   :  { %2185 = vmatprep.subr.bf16.mxu1 %v2184_v6  ;;  %2055 = vmatprep.mubr.msk.f32.mxu0 %vm2323_vm1, %v2322_v8  ;;  %s2327_s28 = smov 88   ;;  %s2328_s29 = smov 72   ;;  %v143_v29 = vld [vmem:[%s2720_s1] sm:$0xff]  ;;  %v835_v47 = vsub.f32 1.0, %v1940_v42  ;;  %vm485_vm3 = vcmask 130112   ;;  %vm658_vm4 = vcmask 195712  }
   0x7   :  { %s2329_s3 = smov 112   ;;  %s2330_s30 = smov 104   ;;  %v144_v30 = vsub.f32 1.0, %v143_v29  ;;  %vm831_vm5 = vcmask 261312  }
   0x8   :  { %s2331_s15 = smov 56   ;;  %s2332_s16 = smov 64   ;;  %v836_v53 = vmul.f32 -10000.0, %v835_v47 }
   0x9   :  { %2187 = vmatpush3.bf16.msra.mxu1 %v2184_v6  ;;  %v145_v31 = vmul.f32 -10000.0, %v144_v30  ;;  %s2333_s1 = smov 40   ;;  %s2334_s21 = smov 48  }
   0xa   :  { %2043 = vmatprep.subr.mxu1 %v2322_v8  ;;  %s2335_s22 = smov 8   ;;  %s2336_s23 = smov 16  }
   0xb   :  { %s2337_s24 = smov 24   ;;  %s2338_s17 = smov [#allocation3]  }
   0xc   :  { %2041 = vmatmul.mubr.msk.f32.vlgmr.msra.gmra.mrb[0].mxu1 %vm61_vm0, %v2437_v7 }
   0xd   :  { %2045 = vmatprep.mubr.msk.f32.mxu1 %vm2323_vm1, %v2322_v8 }
  0xdf   :  { %v2042_v10 = vpop.f32.mrb[0].mxu1 }
  0xe0   :  { %v134_v11 = vpop.f32.mrb[1].mxu1  ;;  %v2458_v13 = vadd.f32 %v2042_v10, %v1925_v9 }
  0xe1   :  { %v2450_v12 = vadd.f32 %v1925_v9, %v134_v11 }
  0xe3   :  { %314 = vrot.lane.b32.xlu1 %v2450_v12, %s2324_s0  ;;  %147 = vrot.lane.b32.xlu0 %v2450_v12, %s2325_s26 }
  0xe7   :  { %489 = vrot.lane.b32.xlu1 %v2450_v12, %s2326_s27  ;;  %316 = vrot.lane.b32.xlu0 %v2450_v12, %s2327_s28 }
  0xeb   :  { %662 = vrot.lane.b32.xlu1 %v2450_v12, %s2328_s29  ;;  %487 = vrot.lane.b32.xlu0 %v2450_v12, %s2329_s3 }
  0xef   :  { %838 = vrot.lane.b32.xlu1 %v2458_v13, %s2325_s26  ;;  %660 = vrot.lane.b32.xlu0 %v2450_v12, %s2330_s30 }
  0xf3   :  { %1004 = vrot.lane.b32.xlu1 %v2458_v13, %s2324_s0  ;;  %1006 = vrot.lane.b32.xlu0 %v2458_v13, %s2327_s28 }
  0xf7   :  { %1176 = vrot.lane.b32.xlu1 %v2458_v13, %s2329_s3  ;;  %1178 = vrot.lane.b32.xlu0 %v2458_v13, %s2326_s27 }
  0xfb   :  { %1348 = vrot.lane.b32.xlu1 %v2458_v13, %s2330_s30  ;;  %1350 = vrot.lane.b32.xlu0 %v2458_v13, %s2328_s29 }
  0xff   :  { %405 = vrot.lane.b32.xlu1 %v2450_v12, %s2331_s15  ;;  %237 = vrot.lane.b32.xlu0 %v2450_v12, %s2332_s16 }
 0x155   :  { %v315_v14 = vpop.permute.xlu1 %314  ;;  %v148_v15 = vpop.permute.xlu0 %147 }
 0x156   :  { %2044 = vmatpush3.xpose.msk.msra.mxu1 %vm149_vm2, %v148_v15 }
 0x157   :  { %2048 = vmatprep.subr.mxu1 %v2322_v8 }
 0x159   :  { %v490_v16 = vpop.permute.xlu1 %489  ;;  %2046 = vmatmul.mubr.msk.f32.vlgmr.msra.gmra.mrb[2].mxu1 %vm149_vm2, %v2450_v12  ;;  %v317_v17 = vpop.permute.xlu0 %316 }
 0x15a   :  { %2054 = vmatpush3.xpose.msk.msra.mxu0 %vm149_vm2, %v317_v17  ;;  %2050 = vmatprep.mubr.msk.f32.mxu1 %vm2323_vm1, %v2322_v8 }
 0x15b   :  { %2063 = vmatprep.subr.mxu0 %v2322_v8 }
 0x15d   :  { %v663_v18 = vpop.permute.xlu1 %662  ;;  %2056 = vmatmul.mubr.msk.f32.vlgmr.msra.gmra.mrb[0].mxu0 %vm149_vm2, %v315_v14  ;;  %v488_v19 = vpop.permute.xlu0 %487 }
 0x15e   :  { %2064 = vmatpush3.xpose.msk.msra.mxu0 %vm149_vm2, %v490_v16  ;;  %2065 = vmatprep.mubr.msk.f32.mxu0 %vm2323_vm1, %v2322_v8 }
 0x15f   :  { %2073 = vmatprep.subr.mxu0 %v2322_v8 }
 0x161   :  { %2066 = vmatmul.mubr.msk.f32.vlgmr.msra.gmra.mrb[2].mxu0 %vm149_vm2, %v488_v19  ;;  %v661_v20 = vpop.permute.xlu0 %660  ;;  %v839_v21 = vpop.permute.xlu1 %838 }
 0x162   :  { %2074 = vmatpush3.xpose.msk.msra.mxu0 %vm149_vm2, %v663_v18  ;;  %2075 = vmatprep.mubr.msk.f32.mxu0 %vm2323_vm1, %v2322_v8 }
 0x163   :  { %2083 = vmatprep.subr.mxu0 %v2322_v8 }
 0x165   :  { %2076 = vmatmul.mubr.msk.f32.vlgmr.msra.gmra.mrb[4].mxu0 %vm149_vm2, %v661_v20  ;;  %v1007_v22 = vpop.permute.xlu0 %1006  ;;  %v1005_v23 = vpop.permute.xlu1 %1004 }
 0x166   :  { %2084 = vmatpush3.xpose.msk.msra.mxu0 %vm149_vm2, %v839_v21  ;;  %2085 = vmatprep.mubr.msk.f32.mxu0 %vm2323_vm1, %v2322_v8 }
 0x167   :  { %2093 = vmatprep.subr.mxu0 %v2322_v8 }
 0x169   :  { %2086 = vmatmul.mubr.msk.f32.vlgmr.msra.gmra.mrb[6].mxu0 %vm149_vm2, %v2458_v13  ;;  %v1179_v24 = vpop.permute.xlu0 %1178  ;;  %v1177_v26 = vpop.permute.xlu1 %1176 }
 0x16a   :  { %2094 = vmatpush3.xpose.msk.msra.mxu0 %vm149_vm2, %v1007_v22  ;;  %2095 = vmatprep.mubr.msk.f32.mxu0 %vm2323_vm1, %v2322_v8 }
 0x16b   :  { %2103 = vmatprep.subr.mxu0 %v2322_v8 }
 0x16d   :  { %2096 = vmatmul.mubr.msk.f32.vlgmr.msra.gmra.mrb[8].mxu0 %vm149_vm2, %v1005_v23  ;;  %v1351_v25 = vpop.permute.xlu0 %1350  ;;  %v1349_v28 = vpop.permute.xlu1 %1348 }
 0x16e   :  { %2104 = vmatpush3.xpose.msk.msra.mxu0 %vm149_vm2, %v1179_v24  ;;  %2105 = vmatprep.mubr.msk.f32.mxu0 %vm2323_vm1, %v2322_v8 }
 0x16f   :  { %2113 = vmatprep.subr.mxu0 %v2322_v8 }
 0x171   :  { %2106 = vmatmul.mubr.msk.f32.vlgmr.msra.gmra.mrb[10].mxu0 %vm149_vm2, %v1177_v26  ;;  %v238_v27 = vpop.permute.xlu0 %237  ;;  %v2530_v16 = vpop.permute.xlu1 %405 }
 0x172   :  { %2049 = vmatpush3.msra.mxu1 %v238_v27  ;;  %2114 = vmatpush3.xpose.msk.msra.mxu0 %vm149_vm2, %v1351_v25 }
 0x173   :  { %2115 = vmatprep.mubr.msk.f32.mxu0 %vm2323_vm1, %v2322_v8  ;;  %2058 = vmatprep.subr.mxu1 %v2322_v8 }
 0x175   :  { %2116 = vmatmul.mubr.msk.f32.vlgmr.msra.gmra.mrb[12].mxu0 %vm149_vm2, %v1349_v28 }
 0x22c   :  { %v220_v32 = vpop.f32.mrb[2].mxu1 }
 0x22d   :  { %v224_v33 = vmul.f32 0.35355338, %v220_v32  ;;  %v2047_v34 = vpop.f32.mrb[3].mxu1 }
 0x22f   :  { %v225_v35 = vadd.f32 %v224_v33, %v145_v31 }
 0x230   :  { %v388_v36 = vpop.f32.mrb[0].mxu0 }
 0x231   :  { %v392_v37 = vmul.f32 0.35355338, %v388_v36  ;;  %v2057_v38 = vpop.f32.mrb[1].mxu0  ;;  %v226_v39 = vsel %vm149_vm2, %v225_v35, -inf }
 0x232   :  { %227 = vmax.xlane.f32.xlu0 %v226_v39 }
 0x233   :  { %v393_v40 = vadd.f32 %v392_v37, %v145_v31 }
 0x234   :  { %v561_v41 = vpop.f32.mrb[2].mxu0 }
 0x235   :  { %v565_v43 = vmul.f32 0.35355338, %v561_v41  ;;  %v2067_v44 = vpop.f32.mrb[3].mxu0  ;;  %v394_v45 = vsel %vm149_vm2, %v393_v40, -inf }
 0x236   :  { %395 = vmax.xlane.f32.xlu1 %v394_v45 }
 0x237   :  { %v566_v46 = vadd.f32 %v565_v43, %v145_v31 }
 0x238   :  { %v734_v48 = vpop.f32.mrb[4].mxu0 }
 0x239   :  { %v738_v49 = vmul.f32 0.35355338, %v734_v48  ;;  %v2077_v50 = vpop.f32.mrb[5].mxu0  ;;  %v567_v51 = vsel %vm149_vm2, %v566_v46, -inf }
 0x23a   :  { %568 = vmax.xlane.f32.xlu0 %v567_v51 }
 0x23b   :  { %v739_v52 = vadd.f32 %v738_v49, %v145_v31 }
 0x23c   :  { %v910_v54 = vpop.f32.mrb[6].mxu0 }
 0x23d   :  { %v914_v55 = vmul.f32 0.35355338, %v910_v54  ;;  %v2087_v56 = vpop.f32.mrb[7].mxu0  ;;  %v740_v57 = vsel %vm149_vm2, %v739_v52, -inf }
 0x23e   :  { %741 = vmax.xlane.f32.xlu0 %v740_v57 }
 0x23f   :  { %v915_v58 = vadd.f32 %v914_v55, %v836_v53 }
 0x240   :  { %v1078_v59 = vpop.f32.mrb[8].mxu0 }
 0x241   :  { %v1082_v60 = vmul.f32 0.35355338, %v1078_v59  ;;  %v2097_v61 = vpop.f32.mrb[9].mxu0  ;;  %v916_v62 = vsel %vm149_vm2, %v915_v58, -inf }
 0x242   :  { %917 = vmax.xlane.f32.xlu1 %v916_v62 }
 0x243   :  { %v1083_v63 = vadd.f32 %v1082_v60, %v836_v53 }
 0x244   :  { %v1250_v0 = vpop.f32.mrb[10].mxu0 }
 0x245   :  { %v1254_v1 = vmul.f32 0.35355338, %v1250_v0  ;;  %v2107_v2 = vpop.f32.mrb[11].mxu0  ;;  %v1084_v3 = vsel %vm149_vm2, %v1083_v63, -inf }
 0x246   :  { %1085 = vmax.xlane.f32.xlu0 %v1084_v3 }
 0x247   :  { %v1255_v4 = vadd.f32 %v1254_v1, %v836_v53 }
 0x248   :  { %v1422_v6 = vpop.f32.mrb[12].mxu0 }
 0x249   :  { %v1426_v9 = vmul.f32 0.35355338, %v1422_v6  ;;  %v2117_v10 = vpop.f32.mrb[13].mxu0  ;;  %v1256_v11 = vsel %vm149_vm2, %v1255_v4, -inf }
 0x24a   :  { %1257 = vmax.xlane.f32.xlu1 %v1256_v11 }
 0x24b   :  { %v1427_v14 = vadd.f32 %v1426_v9, %v836_v53 }
 0x24d   :  { %v1428_v15 = vsel %vm149_vm2, %v1427_v14, -inf }
 0x24e   :  { %1429 = vmax.xlane.f32.xlu0 %v1428_v15 }
 0x25b   :  { %751 = vrot.lane.b32.xlu1 %v2450_v12, %s2333_s1 }
 0x264   :  { %578 = vrot.lane.b32.xlu0 %v2450_v12, %s2334_s21 }
 0x2bf   :  { %v228_v17 = vpop.xlane.xlu0 %227 }
 0x2c0   :  { %v229_v18 = vsub.f32 %v225_v35, %v228_v17 }
 0x2c2   :  { %v230_v19 = vmul.f32 1.442695, %v229_v18 }
 0x2c3   :  { %v396_v20 = vpop.xlane.xlu1 %395 }
 0x2c4   :  { %2254 = vpow2.f32 %v230_v19  ;;  %v397_v21 = vsub.f32 %v393_v40, %v396_v20 }
 0x2c6   :  { %v398_v22 = vmul.f32 1.442695, %v397_v21 }
 0x2c7   :  { %v569_v23 = vpop.xlane.xlu0 %568 }
 0x2c8   :  { %2256 = vpow2.f32 %v398_v22  ;;  %v570_v24 = vsub.f32 %v566_v46, %v569_v23 }
 0x2ca   :  { %v571_v25 = vmul.f32 1.442695, %v570_v24 }
 0x2cb   :  { %v742_v26 = vpop.xlane.xlu0 %741 }
 0x2cc   :  { %2258 = vpow2.f32 %v571_v25  ;;  %v743_v27 = vsub.f32 %v739_v52, %v742_v26 }
 0x2ce   :  { %v2255_v28 = vpop.eup %2254  ;;  %v744_v29 = vmul.f32 1.442695, %v743_v27 }
 0x2cf   :  { %v232_v12 = vsel %vm149_vm2, %v2255_v28, 0.0  ;;  %v918_v36 = vpop.xlane.xlu1 %917 }
 0x2d0   :  { %2260 = vpow2.f32 %v744_v29  ;;  %233 = vadd.xlane.f32.xlu1 %v232_v12  ;;  %v919_v37 = vsub.f32 %v915_v58, %v918_v36 }
 0x2d2   :  { %v2257_v30 = vpop.eup %2256  ;;  %v920_v41 = vmul.f32 1.442695, %v919_v37  ;;  %v1524_v37 = vld [vmem:[%s2723_s4 + $0x10] sm:$0xff] }
 0x2d3   :  { %v400_v31 = vsel %vm149_vm2, %v2257_v30, 0.0  ;;  %v1086_v38 = vpop.xlane.xlu0 %1085 }
 0x2d4   :  { %401 = vadd.xlane.f32.xlu0 %v400_v31  ;;  %v1087_v40 = vsub.f32 %v1083_v63, %v1086_v38  ;;  %2262 = vpow2.f32 %v920_v41  ;;  %v1525_v38 = vld [vmem:[%s2723_s4 + $0x18] sm:$0xff] }
 0x2d6   :  { %v2259_v32 = vpop.eup %2258  ;;  %v1088_v44 = vmul.f32 1.442695, %v1087_v40 }
 0x2d7   :  { %v573_v33 = vsel %vm149_vm2, %v2259_v32, 0.0  ;;  %v1258_v39 = vpop.xlane.xlu1 %1257 }
 0x2d8   :  { %574 = vadd.xlane.f32.xlu1 %v573_v33  ;;  %v1259_v42 = vsub.f32 %v1255_v4, %v1258_v39  ;;  %2264 = vpow2.f32 %v1088_v44  ;;  %v1523_v33 = vld [vmem:[%s2723_s4 + $0x8] sm:$0xff]  ;;  %v2192_v39 = vpack.c.bf16 %v1525_v38, %v1524_v37 }
 0x2da   :  { %v2535_v34 = vpop.eup %2260  ;;  %v1260_v45 = vmul.f32 1.442695, %v1259_v42 }
 0x2db   :  { %v746_v35 = vsel %vm149_vm2, %v2535_v34, 0.0  ;;  %v1430_v43 = vpop.xlane.xlu0 %1429  ;;  %v752_v56 = vpop.permute.xlu1 %751 }
 0x2dc   :  { %747 = vadd.xlane.f32.xlu0 %v746_v35  ;;  %v1431_v46 = vsub.f32 %v1427_v14, %v1430_v43  ;;  %2266 = vpow2.f32 %v1260_v45 }
 0x2de   :  { %v1432_v47 = vmul.f32 1.442695, %v1431_v46  ;;  %v2263_v48 = vpop.eup %2262 }
 0x2df   :  { %v922_v50 = vsel %vm149_vm2, %v2263_v48, 0.0  ;;  %v579_v57 = vpop.permute.xlu0 %578 }
 0x2e0   :  { %2268 = vpow2.f32 %v1432_v47 }
 0x2e2   :  { %v2543_v49 = vpop.eup %2264 }
 0x2e3   :  { %v1090_v53 = vsel %vm149_vm2, %v2543_v49, 0.0 }
 0x2e6   :  { %v2546_v51 = vpop.eup %2266 }
 0x2e7   :  { %v1262_v52 = vsel %vm149_vm2, %v2546_v51, 0.0 }
 0x2e9   :  { %1095 = vrot.lane.b32.xlu1 %v2458_v13, %s2331_s15 }
 0x2ea   :  { %v2552_v54 = vpop.eup %2268 }
 0x2eb   :  { %v1434_v55 = vsel %vm149_vm2, %v2552_v54, 0.0 }
 0x2f2   :  { %927 = vrot.lane.b32.xlu0 %v2458_v13, %s2332_s16 }
 0x30d   :  { %923 = vadd.xlane.f32.xlu1 %v922_v50 }
 0x311   :  { %1263 = vadd.xlane.f32.xlu1 %v1262_v52  ;;  %1091 = vadd.xlane.f32.xlu0 %v1090_v53 }
 0x315   :  { %1435 = vadd.xlane.f32.xlu1 %v1434_v55 }
 0x326   :  { %1439 = vrot.lane.b32.xlu1 %v2458_v13, %s2333_s1 }
 0x327   :  { %1267 = vrot.lane.b32.xlu0 %v2458_v13, %s2334_s21 }
 0x35d   :  { %v234_v58 = vpop.xlane.xlu1 %233 }
 0x35e   :  { %2270 = vrcp.f32 %v234_v58 }
 0x361   :  { %v402_v59 = vpop.xlane.xlu0 %401 }
 0x362   :  { %2272 = vrcp.f32 %v402_v59 }
 0x365   :  { %v575_v60 = vpop.xlane.xlu1 %574 }
 0x366   :  { %2274 = vrcp.f32 %v575_v60 }
 0x368   :  { %v2271_v61 = vpop.eup %2270 }
 0x369   :  { %v236_v62 = vmul.f32 %v2271_v61, %v2255_v28  ;;  %v748_v63 = vpop.xlane.xlu0 %747  ;;  %v1096_v9 = vpop.permute.xlu1 %1095 }
 0x36a   :  { %2276 = vrcp.f32 %v748_v63 }
 0x36b   :  { %2051 = vmatmul.mubr.msk.f32.vlgmr.msra.gmra.mrb[4].mxu1 %vm149_vm2, %v236_v62 }
 0x36c   :  { %v2273_v0 = vpop.eup %2272  ;;  %2059 = vmatpush3.msra.mxu1 %v2530_v16  ;;  %2060 = vmatprep.mubr.msk.f32.mxu1 %vm2323_vm1, %v2322_v8 }
 0x36d   :  { %v404_v13 = vmul.f32 %v2273_v0, %v2257_v30  ;;  %2068 = vmatprep.subr.mxu1 %v2322_v8  ;;  %v928_v6 = vpop.permute.xlu0 %927 }
 0x36f   :  { %2061 = vmatmul.mubr.msk.f32.vlgmr.msra.gmra.mrb[6].mxu1 %vm149_vm2, %v404_v13 }
 0x370   :  { %v2275_v1 = vpop.eup %2274  ;;  %2069 = vmatpush3.msra.mxu1 %v579_v57  ;;  %2070 = vmatprep.mubr.msk.f32.mxu1 %vm2323_vm1, %v2322_v8 }
 0x371   :  { %v577_v2 = vmul.f32 %v2275_v1, %v2259_v32  ;;  %2078 = vmatprep.subr.mxu1 %v2322_v8  ;;  %v1522_v32 = vld [vmem:[%s2723_s4] sm:$0xff] }
 0x372   :  { %v2188_v35 = vpack.c.bf16 %v1523_v33, %v1522_v32  ;;  %v1957_v33 = vld [vmem:[%s2726_s7] ss:$0 sm:$0xff] }
 0x373   :  { %2071 = vmatmul.mubr.msk.f32.vlgmr.msra.gmra.mrb[8].mxu1 %vm149_vm2, %v577_v2 }
 0x374   :  { %v2277_v3 = vpop.eup %2276  ;;  %2079 = vmatpush3.msra.mxu1 %v752_v56  ;;  %2080 = vmatprep.mubr.msk.f32.mxu1 %vm2323_vm1, %v2322_v8 }
 0x375   :  { %v750_v4 = vmul.f32 %v2277_v3, %v2535_v34  ;;  %2088 = vmatprep.subr.mxu1 %v2322_v8 }
 0x377   :  { %2081 = vmatmul.mubr.msk.f32.vlgmr.msra.gmra.mrb[10].mxu1 %vm149_vm2, %v750_v4 }
 0x378   :  { %2089 = vmatpush3.msra.mxu1 %v928_v6  ;;  %2090 = vmatprep.mubr.msk.f32.mxu1 %vm2323_vm1, %v2322_v8 }
 0x379   :  { %2098 = vmatprep.subr.mxu1 %v2322_v8 }
 0x39a   :  { %v924_v10 = vpop.xlane.xlu1 %923 }
 0x39b   :  { %2278 = vrcp.f32 %v924_v10  ;;  %v1662_v10 = vld [vmem:[%s2727_s8 + $0x8] sm:$0xff] }
 0x39e   :  { %v1264_v11 = vpop.xlane.xlu1 %1263  ;;  %v1092_v14 = vpop.xlane.xlu0 %1091 }
 0x39f   :  { %2280 = vrcp.f32 %v1092_v14  ;;  %v1663_v14 = vld [vmem:[%s2727_s8 + $0x10] sm:$0xff] }
 0x3a0   :  { %2282 = vrcp.f32 %v1264_v11 }
 0x3a2   :  { %v1436_v15 = vpop.xlane.xlu1 %1435  ;;  %v1268_v21 = vpop.permute.xlu0 %1267 }
 0x3a3   :  { %2284 = vrcp.f32 %v1436_v15  ;;  %v1664_v15 = vld [vmem:[%s2727_s8 + $0x18] sm:$0xff] }
 0x3a5   :  { %v2279_v16 = vpop.eup %2278 }
 0x3a6   :  { %v926_v17 = vmul.f32 %v2279_v16, %v2263_v48  ;;  %v1440_v24 = vpop.permute.xlu1 %1439  ;;  %v2200_v16 = vpack.c.bf16 %v1664_v15, %v1663_v14 }
 0x3a8   :  { %2091 = vmatmul.mubr.msk.f32.vlgmr.msra.gmra.mrb[12].mxu1 %vm149_vm2, %v926_v17  ;;  %v1763_v17 = vld [vmem:[%s2729_s10] sm:$0xff] }
 0x3a9   :  { %2099 = vmatpush3.msra.mxu1 %v1096_v9  ;;  %2100 = vmatprep.mubr.msk.f32.mxu1 %vm2323_vm1, %v2322_v8  ;;  %v2281_v18 = vpop.eup %2280 }
 0x3aa   :  { %2108 = vmatprep.subr.mxu1 %v2322_v8  ;;  %v1094_v19 = vmul.f32 %v2281_v18, %v2543_v49  ;;  %v2283_v20 = vpop.eup %2282  ;;  %v1764_v18 = vld [vmem:[%s2729_s10 + $0x8] sm:$0xff] }
 0x3ab   :  { %v1266_v22 = vmul.f32 %v2283_v20, %v2546_v51  ;;  %v2204_v20 = vpack.c.bf16 %v1764_v18, %v1763_v17 }
 0x3ac   :  { %2101 = vmatmul.mubr.msk.f32.vlgmr.msra.gmra.mrb[14].mxu1 %vm149_vm2, %v1094_v19  ;;  %v1765_v19 = vld [vmem:[%s2729_s10 + $0x10] sm:$0xff] }
 0x3ad   :  { %2109 = vmatpush3.msra.mxu1 %v1268_v21  ;;  %2110 = vmatprep.mubr.msk.f32.mxu1 %vm2323_vm1, %v2322_v8  ;;  %v2285_v23 = vpop.eup %2284  ;;  %v1766_v21 = vld [vmem:[%s2729_s10 + $0x18] sm:$0xff] }
 0x3ae   :  { %2118 = vmatprep.subr.mxu1 %v2322_v8  ;;  %v1438_v25 = vmul.f32 %v2285_v23, %v2552_v54  ;;  %v1953_v54 = vld [vmem:[%s2724_s5] ss:$0 sm:$0xff]  ;;  %2205 = vmatprep.subr.bf16.mxu0 %v2204_v20 }
 0x3af   :  { %v1767_v23 = vld [vmem:[%s2729_s10 + $0x20] sm:$0xff]  ;;  %2207 = vmatpush3.bf16.msra.mxu0 %v2204_v20 }
 0x3b0   :  { %2111 = vmatmul.mubr.msk.f32.vlgmr.msra.gmra.mrb[16].mxu1 %vm149_vm2, %v1266_v22  ;;  %v2208_v22 = vpack.c.bf16 %v1766_v21, %v1765_v19 }
 0x3b1   :  { %2119 = vmatpush3.msra.mxu1 %v1440_v24  ;;  %2120 = vmatprep.mubr.msk.f32.mxu1 %vm2323_vm1, %v2322_v8  ;;  %v1768_v24 = vld [vmem:[%s2729_s10 + $0x28] sm:$0xff] }
 0x3b2   :  { %2189 = vmatprep.subr.bf16.mxu1 %v2188_v35  ;;  %2209 = vmatprep.subr.bf16.mxu0 %v2208_v22 }
 0x3b3   :  { %2211 = vmatpush3.bf16.msra.mxu0 %v2208_v22 }
 0x3b4   :  { %2121 = vmatmul.mubr.msk.f32.vlgmr.msra.gmra.mrb[18].mxu1 %vm149_vm2, %v1438_v25  ;;  %v2212_v25 = vpack.c.bf16 %v1768_v24, %v1767_v23 }
 0x3b5   :  { %2191 = vmatpush3.bf16.msra.mxu1 %v2188_v35 }
 0x3b6   :  { %2193 = vmatprep.subr.bf16.mxu1 %v2192_v39  ;;  %2213 = vmatprep.subr.bf16.mxu0 %v2212_v25 }
 0x3b7   :  { %2215 = vmatpush3.bf16.msra.mxu0 %v2212_v25 }
 0x3b9   :  { %2195 = vmatpush3.bf16.msra.mxu1 %v2192_v39 }
 0x43e   :  { %v309_v26 = vpop.f32.mrb[4].mxu1 }
 0x43f   :  { %313 = vst.msk [vmem:[#allocation2] sm:$0xff] %vm149_vm2, %v309_v26  ;;  %v2052_v27 = vpop.f32.mrb[5].mxu1 }
 0x442   :  { %v477_v28 = vpop.f32.mrb[6].mxu1 }
 0x443   :  { %482 = vrot.lane.b32.xlu0 %v477_v28, %s2335_s22  ;;  %v2062_v29 = vpop.f32.mrb[7].mxu1 }
 0x446   :  { %v650_v12 = vpop.f32.mrb[8].mxu1 }
 0x447   :  { %655 = vrot.lane.b32.xlu1 %v650_v12, %s2336_s23  ;;  %v2072_v30 = vpop.f32.mrb[9].mxu1 }
 0x44a   :  { %v823_v31 = vpop.f32.mrb[10].mxu1 }
 0x44b   :  { %828 = vrot.lane.b32.xlu1 %v823_v31, %s2337_s24  ;;  %v2082_v8 = vpop.f32.mrb[11].mxu1 }
 0x44c   :  { %v1956_v8 = vld [vmem:[%s2725_s6] ss:$0 sm:$0xff]  ;;  %s1914_s6 = sshll.u32 %s2338_s17, 4  ;;  %s1915_s6 = int_to_ptr.vmem [resolvable:$true] %s1914_s6 }
 0x44d   :  { %s2298_s18 = scalar_lea.vmem %s1915_s6, 256  ;;  %p2303_p1 = scmp.lt.s32.totalorder %s1915_s6, %s1915_s6 }
 0x44e   :  { %p2299_p0 = scmp.ne.s32.totalorder %s1915_s6, %s2298_s18  ;;  %p2304_p2 = scmp.lt.s32.totalorder %s2298_s18, %s2298_s18 }
 0x450   :  { %p2305_p3 = por %p2304_p2, %p2303_p1 }
 0x452   :  { %p2306_p4 = pnand %p2305_p3, %p2299_p0 }
 0x47b   :  { %v999_v34 = vpop.f32.mrb[12].mxu1 }
 0x47c   :  { %1003 = vst.msk [vmem:[#allocation2 + $0x8] sm:$0xff] %vm149_vm2, %v999_v34  ;;  %v2092_v36 = vpop.f32.mrb[13].mxu1 }
 0x47f   :  { %v1167_v40 = vpop.f32.mrb[14].mxu1 }
 0x480   :  { %1172 = vrot.lane.b32.xlu0 %v1167_v40, %s2335_s22  ;;  %v2102_v41 = vpop.f32.mrb[15].mxu1  ;;  %v1769_v40 = vld [vmem:[%s2729_s10 + $0x30] sm:$0xff] }
 0x481   :  { %v1770_v41 = vld [vmem:[%s2729_s10 + $0x38] sm:$0xff] }
 0x483   :  { %v1339_v42 = vpop.f32.mrb[16].mxu1 }
 0x484   :  { %1344 = vrot.lane.b32.xlu0 %v1339_v42, %s2336_s23  ;;  %v2112_v43 = vpop.f32.mrb[17].mxu1  ;;  %v2216_v42 = vpack.c.bf16 %v1770_v41, %v1769_v40 }
 0x485   :  { %v1771_v43 = vld [vmem:[%s2729_s10 + $0x40] sm:$0xff] }
 0x486   :  { %2217 = vmatprep.subr.bf16.mxu0 %v2216_v42 }
 0x487   :  { %v1511_v44 = vpop.f32.mrb[18].mxu1  ;;  %2219 = vmatpush3.bf16.msra.mxu0 %v2216_v42 }
 0x488   :  { %1516 = vrot.lane.b32.xlu1 %v1511_v44, %s2337_s24  ;;  %v2122_v45 = vpop.f32.mrb[19].mxu1  ;;  %v1772_v44 = vld [vmem:[%s2729_s10 + $0x48] sm:$0xff] }
 0x489   :  { %v2220_v45 = vpack.c.bf16 %v1772_v44, %v1771_v43 }
 0x48b   :  { %2221 = vmatprep.subr.bf16.mxu0 %v2220_v45 }
 0x48c   :  { %2223 = vmatpush3.bf16.msra.mxu0 %v2220_v45 }
 0x4b5   :  { %v483_v46 = vpop.permute.xlu0 %482 }
 0x4b6   :  { %486 = vst.msk [vmem:[#allocation2] sm:$0xff] %vm485_vm3, %v483_v46  ;;  %v1773_v46 = vld [vmem:[%s2729_s10 + $0x50] sm:$0xff] }
 0x4b9   :  { %v656_v47 = vpop.permute.xlu1 %655 }
 0x4ba   :  { %659 = vst.msk [vmem:[#allocation2] sm:$0xff] %vm658_vm4, %v656_v47  ;;  %v1774_v47 = vld [vmem:[%s2729_s10 + $0x58] sm:$0xff] }
 0x4bd   :  { %v829_v48 = vpop.permute.xlu1 %828 }
 0x4be   :  { %832 = vst.msk [vmem:[#allocation2] sm:$0xff] %vm831_vm5, %v829_v48  ;;  %v2224_v48 = vpack.c.bf16 %v1774_v47, %v1773_v46 }
 0x4c0   :  { %2225 = vmatprep.subr.bf16.mxu0 %v2224_v48 }
 0x4c1   :  { %2227 = vmatpush3.bf16.msra.mxu0 %v2224_v48 }
 0x4c5   :  { %v1520_v49 = vld [vmem:[#allocation2] sm:$0xff] }
 0x4c6   :  { %2131 = vmatprep.mubr.msk.f32.mxu1 %vm61_vm0, %v1520_v49  ;;  %v1775_v49 = vld [vmem:[%s2729_s10 + $0x60] sm:$0xff] }
 0x4f2   :  { %v1173_v50 = vpop.permute.xlu0 %1172 }
 0x4f3   :  { %1175 = vst.msk [vmem:[#allocation2 + $0x8] sm:$0xff] %vm485_vm3, %v1173_v50  ;;  %v1776_v50 = vld [vmem:[%s2729_s10 + $0x68] sm:$0xff] }
 0x4f6   :  { %v1345_v51 = vpop.permute.xlu0 %1344 }
 0x4f7   :  { %1347 = vst.msk [vmem:[#allocation2 + $0x8] sm:$0xff] %vm658_vm4, %v1345_v51  ;;  %v2228_v51 = vpack.c.bf16 %v1776_v50, %v1775_v49 }
 0x4f9   :  { %2229 = vmatprep.subr.bf16.mxu0 %v2228_v51 }
 0x4fa   :  { %v1517_v52 = vpop.permute.xlu1 %1516  ;;  %2231 = vmatpush3.bf16.msra.mxu0 %v2228_v51 }
 0x4fb   :  { %1519 = vst.msk [vmem:[#allocation2 + $0x8] sm:$0xff] %vm831_vm5, %v1517_v52  ;;  %v1777_v52 = vld [vmem:[%s2729_s10 + $0x70] sm:$0xff] }
 0x502   :  { %v1521_v53 = vld [vmem:[#allocation2 + $0x8] sm:$0xff] }
 0x503   :  { %2132 = vmatmul.mubr.msk.f32.vlgmr.msra.gmra.mrb[20].mxu1 %vm61_vm0, %v1521_v53  ;;  %v1778_v53 = vld [vmem:[%s2729_s10 + $0x78] sm:$0xff] }
 0x5d6   :  { %v2133_v55 = vpop.f32.mrb[20].mxu1 }
 0x5d7   :  { %v1611_v56 = vadd.f32 %v2133_v55, %v1953_v54  ;;  %v1605_v57 = vpop.f32.mrb[21].mxu1  ;;  %v1958_v55 = vld [vmem:[%s2728_s9] ss:$0 sm:$0xff] }
 0x5d8   :  { %v1606_v58 = vadd.f32 %v1953_v54, %v1605_v57  ;;  %v2232_v54 = vpack.c.bf16 %v1778_v53, %v1777_v52 }
 0x5d9   :  { %v1615_v59 = vadd.f32 %v1611_v56, %v2437_v7 }
 0x5da   :  { %v1614_v60 = vadd.f32 %v1606_v58, %v2430_v5  ;;  %v1661_v5 = vld [vmem:[%s2727_s8] sm:$0xff]  ;;  %2233 = vmatprep.subr.bf16.mxu0 %v2232_v54 }
 0x5db   :  { %v1621_v61 = vsel %vm61_vm0, %v1615_v59, 0.0  ;;  %v2196_v11 = vpack.c.bf16 %v1662_v10, %v1661_v5  ;;  %2235 = vmatpush3.bf16.msra.mxu0 %v2232_v54 }
 0x5dc   :  { %1622 = vadd.xlane.f32.xlu1 %v1621_v61  ;;  %v1618_v62 = vsel %vm61_vm0, %v1614_v60, 0.0 }
 0x5dd   :  { %1619 = vadd.xlane.f32.xlu0 %v1618_v62  ;;  %2197 = vmatprep.subr.bf16.mxu1 %v2196_v11 }
 0x5de   :  { %2199 = vmatpush3.bf16.msra.mxu1 %v2196_v11 }
 0x5df   :  { %2201 = vmatprep.subr.bf16.mxu1 %v2200_v16 }
 0x5e2   :  { %2203 = vmatpush3.bf16.msra.mxu1 %v2200_v16 }
 0x669   :  { %v1623_v63 = vpop.xlane.xlu1 %1622 }
 0x66a   :  { %v1626_v0 = vmul.f32 0.03125, %v1623_v63  ;;  %v1620_v13 = vpop.xlane.xlu0 %1619 }
 0x66b   :  { %v1625_v1 = vmul.f32 0.03125, %v1620_v13 }
 0x66c   :  { %v1628_v2 = vsub.f32 %v1615_v59, %v1626_v0 }
 0x66d   :  { %v1627_v3 = vsub.f32 %v1614_v60, %v1625_v1 }
 0x66e   :  { %v1630_v9 = vmul.f32 %v1628_v2, %v1628_v2 }
 0x66f   :  { %v1629_v4 = vmul.f32 %v1627_v3, %v1627_v3 }
 0x670   :  { %v1634_v7 = vsel %vm61_vm0, %v1630_v9, 0.0 }
 0x671   :  { %v1631_v6 = vsel %vm61_vm0, %v1629_v4, 0.0 }
 0x672   :  { %1632 = vadd.xlane.f32.xlu0 %v1631_v6  ;;  %v1961_v6 = vld [vmem:[%s2730_s11] ss:$0 sm:$0xff] }
 0x676   :  { %1635 = vadd.xlane.f32.xlu0 %v1634_v7 }
 0x6ff   :  { %v1633_v26 = vpop.xlane.xlu0 %1632 }
 0x700   :  { %v1637_v27 = vmul.f32 0.03125, %v1633_v26 }
 0x702   :  { %v1639_v28 = vadd.f32 1e-12, %v1637_v27 }
 0x703   :  { %v1636_v29 = vpop.xlane.xlu0 %1635 }
 0x704   :  { %2286 = vrsqrt.f32 %v1639_v28  ;;  %v1638_v12 = vmul.f32 0.03125, %v1636_v29 }
 0x706   :  { %v1640_v30 = vadd.f32 1e-12, %v1638_v12 }
 0x708   :  { %2288 = vrsqrt.f32 %v1640_v30 }
 0x70e   :  { %v2287_v31 = vpop.eup %2286 }
 0x70f   :  { %v1643_v32 = vmul.f32 %v2287_v31, %v1627_v3 }
 0x711   :  { %v1651_v34 = vmul.f32 %v1956_v8, %v1643_v32  ;;  %v1962_v32 = vld [vmem:[%s2731_s12] ss:$0 sm:$0xff] }
 0x712   :  { %v2289_v35 = vpop.eup %2288 }
 0x713   :  { %v1644_v36 = vmul.f32 %v2289_v35, %v1628_v2  ;;  %v1659_v37 = vadd.f32 %v1957_v33, %v1651_v34 }
 0x715   :  { %v1652_v38 = vmul.f32 %v1956_v8, %v1644_v36  ;;  %2142 = vmatprep.mubr.msk.f32.mxu1 %vm61_vm0, %v1659_v37  ;;  %v1963_v36 = vld [vmem:[%s2732_s13] ss:$0 sm:$0xff] }
 0x717   :  { %v1660_v39 = vadd.f32 %v1957_v33, %v1652_v38 }
 0x719   :  { %2143 = vmatmul.mubr.msk.f32.vlgmr.msra.gmra.mrb[22].mxu1 %vm61_vm0, %v1660_v39 }
 0x7ec   :  { %v2144_v56 = vpop.f32.mrb[22].mxu1 }
 0x7ed   :  { %v1750_v57 = vadd.f32 %v2144_v56, %v1958_v55  ;;  %v1744_v58 = vpop.f32.mrb[23].mxu1 }
 0x7ee   :  { %v1745_v59 = vadd.f32 %v1958_v55, %v1744_v58 }
 0x7ef   :  { %v1756_v60 = vmul.f32 0.70710677, %v1750_v57  ;;  %v1754_v2 = vmul.f32 0.5, %v1750_v57 }
 0x7f0   :  { %v1755_v61 = vmul.f32 0.70710677, %v1745_v59  ;;  %v1753_v13 = vmul.f32 0.5, %v1745_v59 }
 0x7f1   :  { %2290 = verf.f32 %v1756_v60 }
 0x7f2   :  { %2292 = verf.f32 %v1755_v61 }
 0x7fb   :  { %v2291_v62 = vpop.eup %2290 }
 0x7fc   :  { %v2293_v63 = vpop.eup %2292  ;;  %v1760_v0 = vadd.f32 1.0, %v2291_v62 }
 0x7fd   :  { %v1759_v1 = vadd.f32 1.0, %v2293_v63 }
 0x7fe   :  { %v1762_v4 = vmul.f32 %v1760_v0, %v1754_v2 }
 0x7ff   :  { %v1761_v3 = vmul.f32 %v1759_v1, %v1753_v13 }
 0x801   :  { %2177 = vmatprep.mubr.f32.mxu0 %v1761_v3 }
 0x802   :  { %2178 = vmatmul.mubr.f32.vlgmr.msra.gmra.mrb[14].mxu0 %v1762_v4 }
 0x8d5   :  { %v2179_v9 = vpop.f32.mrb[14].mxu0 }
 0x8d6   :  { %v1858_v7 = vadd.f32 %v2179_v9, %v1961_v6  ;;  %v1852_v5 = vpop.f32.mrb[15].mxu0 }
 0x8d7   :  { %v1853_v10 = vadd.f32 %v1961_v6, %v1852_v5 }
 0x8d8   :  { %v1862_v11 = vadd.f32 %v1858_v7, %v1660_v39 }
 0x8d9   :  { %v1861_v14 = vadd.f32 %v1853_v10, %v1659_v37 }
 0x8da   :  { %v1868_v15 = vsel %vm61_vm0, %v1862_v11, 0.0 }
 0x8db   :  { %1869 = vadd.xlane.f32.xlu0 %v1868_v15  ;;  %v1865_v16 = vsel %vm61_vm0, %v1861_v14, 0.0 }
 0x8dc   :  { %1866 = vadd.xlane.f32.xlu1 %v1865_v16 }
 0x968   :  { %v1870_v17 = vpop.xlane.xlu0 %1869 }
 0x969   :  { %v1872_v18 = vmul.f32 0.03125, %v1870_v17  ;;  %v1867_v19 = vpop.xlane.xlu1 %1866 }
 0x96a   :  { %v1871_v20 = vmul.f32 0.03125, %v1867_v19 }
 0x96b   :  { %v1874_v21 = vsub.f32 %v1862_v11, %v1872_v18 }
 0x96c   :  { %v1873_v22 = vsub.f32 %v1861_v14, %v1871_v20 }
 0x96d   :  { %v1876_v23 = vmul.f32 %v1874_v21, %v1874_v21 }
 0x96e   :  { %v1875_v24 = vmul.f32 %v1873_v22, %v1873_v22 }
 0x96f   :  { %v1880_v25 = vsel %vm61_vm0, %v1876_v23, 0.0 }
 0x970   :  { %1881 = vadd.xlane.f32.xlu0 %v1880_v25  ;;  %v1877_v26 = vsel %vm61_vm0, %v1875_v24, 0.0 }
 0x971   :  { %1878 = vadd.xlane.f32.xlu1 %v1877_v26 }
 0x9fd   :  { %v1882_v27 = vpop.xlane.xlu0 %1881 }
 0x9fe   :  { %v1884_v28 = vmul.f32 0.03125, %v1882_v27  ;;  %v1879_v29 = vpop.xlane.xlu1 %1878 }
 0x9ff   :  { %v1883_v12 = vmul.f32 0.03125, %v1879_v29 }
 0xa00   :  { %v1886_v30 = vadd.f32 1e-12, %v1884_v28 }
 0xa01   :  { %v1885_v31 = vadd.f32 1e-12, %v1883_v12 }
 0xa02   :  { %2294 = vrsqrt.f32 %v1886_v30 }
 0xa03   :  { %2296 = vrsqrt.f32 %v1885_v31 }
 0xa0c   :  { %v2295_v8 = vpop.eup %2294 }
 0xa0d   :  { %v2297_v33 = vpop.eup %2296  ;;  %v1890_v34 = vmul.f32 %v2295_v8, %v1874_v21 }
 0xa0e   :  { %v1889_v35 = vmul.f32 %v2297_v33, %v1873_v22 }
 0xa0f   :  { %v1898_v37 = vmul.f32 %v1962_v32, %v1890_v34 }
 0xa10   :  { %v1897_v38 = vmul.f32 %v1962_v32, %v1889_v35 }
 0xa11   :  { %v1906_v39 = vadd.f32 %v1963_v36, %v1898_v37 }
 0xa12   :  { %v1905_v40 = vadd.f32 %v1963_v36, %v1897_v38 }
 0xa13   :  { %1908 = vst.msk [vmem:[#allocation3 + $0x8] sm:$0xff] %vm61_vm0, %v1906_v39 }
 0xa14   :  { %1907 = vst.msk [vmem:[#allocation3] sm:$0xff] %vm61_vm0, %v1905_v40 }
 0xa15   :  { %2309 = shalt.err (!%p2306_p4)
}
 0xa16   :  { %s2310_s7 = scalar_lea.hbm %s2733_s14, 256 }
 0xa17   :  { %p2311_p5 = scmp.ne.s32.totalorder %s2733_s14, %s2310_s7  ;;  %p2314_p6 = scmp.lt.u32.totalorder %s2310_s7, %s2733_s14 }
 0xa19   :  { %p2316_p7 = pnand %p2314_p6, %p2311_p5 }
 0xa1b   :  { %2319 = shalt.err (!%p2316_p7)
}
 0xa1c   :  { %s2339_s23 = smov 128  }
 0xa1d   :  { %1920 = dma.vmem_to_hbm [thread:$0]  %s1915_s6, 256, %s2733_s14, [#allocation4], %s2339_s23, %s2339_s23, %s2335_s22  }
 0xa1e   :  { %2320 = dma.done.wait [#allocation4], 256  }
 0xa1f   :  { %2321 = vsyncadd [#allocation4], 4294967040 }
 0xa20   :  { %1924 = vsyncpa [#allocation4], 1 }

</bundles_post_ra>
